<compile_context>
chip_gen: v7x
topology: tpu7x:2x2x1
jax: 0.10.0
libtpu: 0.0.40
codegen_flags: <defaults>
</compile_context>

<pallas_src>
import functools

import jax
import jax.numpy as jnp
from jax.experimental import pallas as pl
from jax.experimental.pallas import tpu as pltpu


def _padded_k(k_raw):
    # Contraction depth: raw K + 1 (ones row carrying the folded bn1 shift),
    # padded to a bf16-sublane-friendly width (>=32, multiple of 16).
    return max(32, ((k_raw + 1 + 15) // 16) * 16)


def _round_up(x, m):
    return ((x + m - 1) // m) * m


def _mbv3_kernel(patches_ref, w_stem_ref, w_head_ref, b_head_ref,
                 w_cls_ref, b_cls_ref, out_ref, *, group, ohw_pad, inv_ohw):
    # conv_stem + folded bn1 as one bf16 MXU matmul in the transposed,
    # lane-dense orientation: (Cstem, K_pad) @ (K_pad, G*OHW_pad) -> f32.
    y_t = jnp.dot(w_stem_ref[...], patches_ref[...],
                  preferred_element_type=jnp.float32)          # (Cstem, G*OHW_pad)
    y_t = jnp.maximum(y_t, 0.0)                                # act1 (ReLU)

    # Global average pool per image.  Padded spatial columns are exactly zero
    # (their patch column, including the ones row, is zero and ReLU(0)=0), so
    # a plain lane-sum over each image's OHW_pad-wide segment is the spatial
    # sum.  `group` is a small compile-time int -> static unroll.
    cols = []
    for g in range(group):
        seg = y_t[:, g * ohw_pad:(g + 1) * ohw_pad]            # static 128-aligned slice
        cols.append(jnp.sum(seg, axis=1, keepdims=True))       # (Cstem, 1)
    pooled_t = jnp.concatenate(cols, axis=1) * inv_ohw         # (Cstem, G) f32

    # conv_head (1x1 conv == linear, + bias) + act2, then classifier; all kept
    # in the transposed orientation so each matmul is a plain (M,K)x(K,N) dot.
    h_t = jnp.dot(w_head_ref[...], pooled_t,
                  preferred_element_type=jnp.float32) + b_head_ref[...]
    h_t = jnp.maximum(h_t, 0.0)                                # (NF, G)
    logits_t = jnp.dot(w_cls_ref[...], h_t,
                       preferred_element_type=jnp.float32) + b_cls_ref[...]
    out_ref[0] = logits_t                                      # (NCLS, G)


def _im2col_stride2(x_nchw, KH=3, KW=3, S=2, P=1):
    """NCHW -> (N, OH*OW, KH*KW*Cin) im2col patches (tap order kh, kw, cin)."""
    N, Cin, H, W = x_nchw.shape
    OH = (H + 2 * P - KH) // S + 1
    OW = (W + 2 * P - KW) // S + 1
    x = jnp.transpose(x_nchw, (0, 2, 3, 1))                    # (N,H,W,Cin)
    xp = jnp.pad(x, ((0, 0), (P, P), (P, P), (0, 0)))
    taps = []
    for kh in range(KH):
        for kw in range(KW):
            taps.append(xp[:, kh:kh + S * OH:S, kw:kw + S * OW:S, :])
    patches = jnp.stack(taps, axis=3)                          # (N,OH,OW,9,Cin)
    return patches.reshape(N, OH * OW, KH * KW * Cin), OH, OW


def mbv3_teacher_forward(x_nchw, kparams, *, target_block_bytes=1 << 20):
    """x_nchw: (N, Cin, H, W) f32.  Returns logits (N, num_classes) f32."""
    N = x_nchw.shape[0]
    patches, OH, OW = _im2col_stride2(x_nchw)
    OHW = OH * OW
    K = patches.shape[-1]
    K_pad = _padded_k(K)
    OHW_pad = _round_up(OHW, 128)        # 128-lane aligned per-image segments

    # Append the ones column (carries the folded bn1 shift) for REAL spatial
    # positions only, pad K+1 -> K_pad and OHW -> OHW_pad with zeros, then lay
    # out lane-dense/transposed: (K_pad, N*OHW_pad), columns image-major.
    ones = jnp.ones((N, OHW, 1), patches.dtype)
    patches = jnp.concatenate([patches, ones], axis=-1)        # (N, OHW, K+1)
    patches = jnp.pad(patches, ((0, 0), (0, OHW_pad - OHW), (0, K_pad - (K + 1))))
    patches_t = jnp.transpose(patches, (2, 0, 1)).reshape(K_pad, N * OHW_pad)
    patches_t = patches_t.astype(jnp.bfloat16)
    # TODO(synk): in-kernel im2col (strided taps from raw NHWC) would remove
    # this HBM materialization entirely.

    w_stem_t = kparams["w_stem_aug_t"]   # (Cstem, K_pad) bf16, bn1 folded
    w_head_t = kparams["w_head_t"]       # (NF, Cstem) f32
    b_head_c = kparams["b_head_col"]     # (NF, 1)
    w_cls_t = kparams["w_cls_t"]         # (NCLS, NF)
    b_cls_c = kparams["b_cls_col"]       # (NCLS, 1)
    Cstem = w_stem_t.shape[0]
    NF = w_head_t.shape[0]
    NCLS = w_cls_t.shape[0]
    assert w_stem_t.shape[1] == K_pad

    # G whole images per grid step, targeting ~target_block_bytes of patch
    # data per step (largest divisor of N under the cap, at least 1).
    per_image_bytes = K_pad * OHW_pad * 2                      # bf16
    cap = max(1, target_block_bytes // per_image_bytes)
    G = max(g for g in range(1, N + 1) if N % g == 0 and g <= cap)
    steps = N // G

    kernel = functools.partial(_mbv3_kernel, group=G, ohw_pad=OHW_pad,
                               inv_ohw=1.0 / OHW)

    out_t = pl.pallas_call(
        kernel,
        out_shape=jax.ShapeDtypeStruct((steps, NCLS, G), jnp.float32),
        grid_spec=pltpu.PrefetchScalarGridSpec(
            num_scalar_prefetch=0,
            grid=(steps,),
            in_specs=[
                pl.BlockSpec((K_pad, G * OHW_pad), lambda i: (0, i)),  # patches^T
                pl.BlockSpec((Cstem, K_pad), lambda i: (0, 0)),        # stem+bn (resident)
                pl.BlockSpec((NF, Cstem), lambda i: (0, 0)),           # head w^T
                pl.BlockSpec((NF, 1), lambda i: (0, 0)),               # head b (col)
                pl.BlockSpec((NCLS, NF), lambda i: (0, 0)),            # cls w^T
                pl.BlockSpec((NCLS, 1), lambda i: (0, 0)),             # cls b (col)
            ],
            out_specs=pl.BlockSpec((1, NCLS, G), lambda i: (i, 0, 0)),
        ),
        compiler_params=pltpu.CompilerParams(
            # Every step handles its own images end-to-end (no accumulator,
            # no finalize) -> fully parallel grid; usable by both v7x TCs.
            dimension_semantics=("parallel",),
            vmem_limit_bytes=32 * 1024 * 1024),
    )(patches_t, w_stem_t, w_head_t, b_head_c, w_cls_t, b_cls_c)

    # (steps, NCLS, G) -> (N, NCLS); tiny XLA transpose outside the kernel.
    return jnp.transpose(out_t, (0, 2, 1)).reshape(N, NCLS)


def make_params(key, in_chans=3, stem_size=16, num_features=128, num_classes=32):
    """Deterministic synthetic parameters mirroring the PyTorch module shapes
    (math-level, unfolded, f32)."""
    ks = jax.random.split(key, 6)
    KH = KW = 3
    # conv_stem weight, torch layout (Cout, Cin, KH, KW), no bias
    w_stem_t = jax.random.normal(ks[0], (stem_size, in_chans, KH, KW),
                                 jnp.float32) * (2.0 / (KH * KW * stem_size)) ** 0.5
    # fold into (KH*KW*Cin, Cout) matching im2col (kh, kw, cin) tap order
    w_stem = jnp.transpose(w_stem_t, (2, 3, 1, 0)).reshape(KH * KW * in_chans,
                                                           stem_size)
    # bn1 (inference) scale/shift
    gamma = 1.0 + 0.1 * jax.random.normal(ks[1], (stem_size,), jnp.float32)
    beta = 0.1 * jax.random.normal(ks[2], (stem_size,), jnp.float32)
    run_mean = 0.05 * jax.random.normal(ks[3], (stem_size,), jnp.float32)
    run_var = jnp.ones((stem_size,), jnp.float32)
    eps = 1e-5
    bn_scale = gamma / jnp.sqrt(run_var + eps)
    bn_shift = beta - run_mean * bn_scale
    # conv_head: 1x1 conv (NF, Cstem, 1, 1) + bias  == linear
    w_head_torch = jax.random.normal(ks[4], (num_features, stem_size),
                                     jnp.float32) * (2.0 / num_features) ** 0.5
    b_head = jnp.zeros((num_features,), jnp.float32)
    # classifier Linear(NF, NCLS)
    w_cls_torch = jax.random.normal(ks[5], (num_classes, num_features),
                                    jnp.float32) * 0.01
    b_cls = jnp.zeros((num_classes,), jnp.float32)
    return {
        "w_stem": w_stem,
        "bn_scale": bn_scale.reshape(1, stem_size),
        "bn_shift": bn_shift.reshape(1, stem_size),
        "w_head": jnp.transpose(w_head_torch),       # (Cstem, NF)
        "b_head": b_head.reshape(1, num_features),
        "w_cls": jnp.transpose(w_cls_torch),         # (NF, NCLS)
        "b_cls": b_cls.reshape(1, num_classes),
    }


def fold_params_for_kernel(params):
    """Pre-fold bn1 into the stem weight and lay everything out for the
    transposed (lane-dense) kernel.

    Columns of w_stem_aug_t (contraction dim, padded to K_pad):
      [0, K)     : conv_stem weights scaled by the bn1 scale
      K          : bn1 shift (matched by the all-ones patch row)
      (K, K_pad) : zeros
    """
    w_stem = params["w_stem"]                      # (K, Cstem) f32
    K, Cstem = w_stem.shape
    K_pad = _padded_k(K)
    w_scaled = w_stem * params["bn_scale"]         # fold bn1 scale into weights
    w_aug = jnp.zeros((K_pad, Cstem), jnp.float32)
    w_aug = w_aug.at[:K].set(w_scaled)
    w_aug = w_aug.at[K].set(params["bn_shift"][0])
    return {
        "w_stem_aug_t": jnp.transpose(w_aug).astype(jnp.bfloat16),  # (Cstem, K_pad)
        "w_head_t": jnp.transpose(params["w_head"]),                # (NF, Cstem)
        "b_head_col": jnp.transpose(params["b_head"]),              # (NF, 1)
        "w_cls_t": jnp.transpose(params["w_cls"]),                  # (NCLS, NF)
        "b_cls_col": jnp.transpose(params["b_cls"]),                # (NCLS, 1)
    }


def _reference_forward(x_nchw, params):
    """Pure-JAX f32 reference of the same math."""
    patches, OH, OW = _im2col_stride2(x_nchw)
    y = jnp.einsum("npk,kc->npc", patches, params["w_stem"],
                   precision=jax.lax.Precision.HIGHEST)
    y = jnp.maximum(y * params["bn_scale"] + params["bn_shift"], 0.0)
    pooled = jnp.mean(y, axis=1)
    h = jnp.maximum(pooled @ params["w_head"] + params["b_head"], 0.0)
    return h @ params["w_cls"] + params["b_cls"]


if __name__ == "__main__":
    key = jax.random.PRNGKey(0)
    k_x, k_p = jax.random.split(key)

    N, Cin, H, W = 2, 3, 16, 16
    stem_size, num_features, num_classes = 16, 128, 32

    x = jax.random.normal(k_x, (N, Cin, H, W), jnp.float32)
    params = make_params(k_p, in_chans=Cin, stem_size=stem_size,
                         num_features=num_features, num_classes=num_classes)
    kparams = fold_params_for_kernel(params)

    fwd = jax.jit(mbv3_teacher_forward)
    logits = jax.block_until_ready(fwd(x, kparams))

    ref = _reference_forward(x, params)
    assert logits.shape == (N, num_classes)
    # Stem matmul intentionally runs with bf16 operands (MXU rate, lane-dense
    # bf16 HBM traffic); tolerance sized for bf16-class error vs f32 HIGHEST.
    assert bool(jnp.allclose(logits, ref, atol=3e-2, rtol=3e-2)), \
        "mismatch vs reference"

    print("KERNEL_OK")
</pallas_src>

<mosaic_0001>
module attributes {stable_mosaic.version = 11 : i64} {
  func.func @_mbv3_kernel(%arg0: i32, %arg1: memref<32x256xbf16, #tpu.memory_space<vmem>>, %arg2: memref<16x32xbf16, #tpu.memory_space<vmem>>, %arg3: memref<128x16xf32, #tpu.memory_space<vmem>>, %arg4: memref<128x1xf32, #tpu.memory_space<vmem>>, %arg5: memref<32x128xf32, #tpu.memory_space<vmem>>, %arg6: memref<32x1xf32, #tpu.memory_space<vmem>>, %arg7: memref<1x32x2xf32, #tpu.memory_space<vmem>>) attributes {dimension_semantics = [#tpu.dimension_semantics<parallel>], iteration_bounds = array<i64: 1>, scalar_prefetch = 0 : i64, scratch_operands = 0 : i64, tpu.core_type = #tpu.core_type<tc>, window_params = [{transform_indices = @transform_0, window_bounds = array<i64: 32, 256>}, {pipeline_mode = #tpu.pipeline_mode<synchronous>, transform_indices = @transform_1, window_bounds = array<i64: 16, 32>}, {pipeline_mode = #tpu.pipeline_mode<synchronous>, transform_indices = @transform_2, window_bounds = array<i64: 128, 16>}, {pipeline_mode = #tpu.pipeline_mode<synchronous>, transform_indices = @transform_3, window_bounds = array<i64: 128, 1>}, {pipeline_mode = #tpu.pipeline_mode<synchronous>, transform_indices = @transform_4, window_bounds = array<i64: 32, 128>}, {pipeline_mode = #tpu.pipeline_mode<synchronous>, transform_indices = @transform_5, window_bounds = array<i64: 32, 1>}, {transform_indices = @transform_6, window_bounds = array<i64: 1, 32, 2>}]} {
    %c0 = arith.constant 0 : index
    %c0_0 = arith.constant 0 : index
    %0 = vector.load %arg2[%c0, %c0_0] : memref<16x32xbf16, #tpu.memory_space<vmem>>, vector<16x32xbf16>
    %c0_1 = arith.constant 0 : index
    %c0_2 = arith.constant 0 : index
    %1 = vector.load %arg1[%c0_1, %c0_2] : memref<32x256xbf16, #tpu.memory_space<vmem>>, vector<32x256xbf16>
    %cst = arith.constant dense<0.000000e+00> : vector<16x256xf32>
    %2 = tpu.matmul %0, %1, %cst {dimension_numbers = #tpu.dot_dimension_numbers<[1], [0], [0], [1], [0, 0, 1, 1], [], []>} : vector<16x32xbf16>, vector<32x256xbf16>, vector<16x256xf32> -> vector<16x256xf32>
    %cst_3 = arith.constant 0.000000e+00 : f32
    %3 = vector.broadcast %cst_3 : f32 to vector<16x256xf32>
    %4 = arith.maximumf %2, %3 : vector<16x256xf32>
    %5 = vector.extract_strided_slice %4 {offsets = [0, 0], sizes = [16, 128], strides = [1, 1]} : vector<16x256xf32> to vector<16x128xf32>
    %cst_4 = arith.constant dense<0.000000e+00> : vector<16xf32>
    %6 = vector.multi_reduction <add>, %5, %cst_4 [1] : vector<16x128xf32> to vector<16xf32>
    %7 = vector.shape_cast %6 : vector<16xf32> to vector<16x1xf32>
    %8 = vector.extract_strided_slice %4 {offsets = [0, 128], sizes = [16, 128], strides = [1, 1]} : vector<16x256xf32> to vector<16x128xf32>
    %cst_5 = arith.constant dense<0.000000e+00> : vector<16xf32>
    %9 = vector.multi_reduction <add>, %8, %cst_5 [1] : vector<16x128xf32> to vector<16xf32>
    %10 = vector.shape_cast %9 : vector<16xf32> to vector<16x1xf32>
    %11 = tpu.concatenate %7, %10 in 1 : vector<16x1xf32>, vector<16x1xf32> -> vector<16x2xf32>
    %cst_6 = arith.constant 1.562500e-02 : f32
    %12 = vector.broadcast %cst_6 : f32 to vector<16x2xf32>
    %13 = arith.mulf %11, %12 : vector<16x2xf32>
    %c0_7 = arith.constant 0 : index
    %c0_8 = arith.constant 0 : index
    %14 = vector.load %arg3[%c0_7, %c0_8] : memref<128x16xf32, #tpu.memory_space<vmem>>, vector<128x16xf32>
    %cst_9 = arith.constant dense<0.000000e+00> : vector<128x2xf32>
    %15 = tpu.matmul %14, %13, %cst_9 {dimension_numbers = #tpu.dot_dimension_numbers<[1], [0], [0], [1], [0, 0, 1, 1], [], []>} : vector<128x16xf32>, vector<16x2xf32>, vector<128x2xf32> -> vector<128x2xf32>
    %c0_10 = arith.constant 0 : index
    %c0_11 = arith.constant 0 : index
    %16 = vector.load %arg4[%c0_10, %c0_11] : memref<128x1xf32, #tpu.memory_space<vmem>>, vector<128x1xf32>
    %17 = vector.broadcast %16 : vector<128x1xf32> to vector<128x2xf32>
    %18 = arith.addf %15, %17 : vector<128x2xf32>
    %cst_12 = arith.constant 0.000000e+00 : f32
    %19 = vector.broadcast %cst_12 : f32 to vector<128x2xf32>
    %20 = arith.maximumf %18, %19 : vector<128x2xf32>
    %c0_13 = arith.constant 0 : index
    %c0_14 = arith.constant 0 : index
    %21 = vector.load %arg5[%c0_13, %c0_14] : memref<32x128xf32, #tpu.memory_space<vmem>>, vector<32x128xf32>
    %cst_15 = arith.constant dense<0.000000e+00> : vector<32x2xf32>
    %22 = tpu.matmul %21, %20, %cst_15 {dimension_numbers = #tpu.dot_dimension_numbers<[1], [0], [0], [1], [0, 0, 1, 1], [], []>} : vector<32x128xf32>, vector<128x2xf32>, vector<32x2xf32> -> vector<32x2xf32>
    %c0_16 = arith.constant 0 : index
    %c0_17 = arith.constant 0 : index
    %23 = vector.load %arg6[%c0_16, %c0_17] : memref<32x1xf32, #tpu.memory_space<vmem>>, vector<32x1xf32>
    %24 = vector.broadcast %23 : vector<32x1xf32> to vector<32x2xf32>
    %25 = arith.addf %22, %24 : vector<32x2xf32>
    %c0_18 = arith.constant 0 : index
    %c0_19 = arith.constant 0 : index
    %c0_20 = arith.constant 0 : index
    %26 = vector.load %arg7[%c0_18, %c0_19, %c0_20] : memref<1x32x2xf32, #tpu.memory_space<vmem>>, vector<1x32x2xf32>
    %27 = vector.shape_cast %26 : vector<1x32x2xf32> to vector<32x2xf32>
    %28 = vector.shape_cast %25 : vector<32x2xf32> to vector<1x32x2xf32>
    tpu.vector_store %arg7[%c0_18, %c0_19, %c0_20], %28 {strides = array<i32>} : memref<1x32x2xf32, #tpu.memory_space<vmem>>, vector<1x32x2xf32>,
    return
  }
  func.func @transform_0(%arg0: i32) -> (i32, i32) {
    %c0_i32 = arith.constant 0 : i32
    %c0_i32_0 = arith.constant 0 : i32
    return %c0_i32, %arg0 : i32, i32
  }
  func.func @transform_1(%arg0: i32) -> (i32, i32) {
    %c0_i32 = arith.constant 0 : i32
    %c0_i32_0 = arith.constant 0 : i32
    %c0_i32_1 = arith.constant 0 : i32
    return %c0_i32, %c0_i32_0 : i32, i32
  }
  func.func @transform_2(%arg0: i32) -> (i32, i32) {
    %c0_i32 = arith.constant 0 : i32
    %c0_i32_0 = arith.constant 0 : i32
    %c0_i32_1 = arith.constant 0 : i32
    return %c0_i32, %c0_i32_0 : i32, i32
  }
  func.func @transform_3(%arg0: i32) -> (i32, i32) {
    %c0_i32 = arith.constant 0 : i32
    %c0_i32_0 = arith.constant 0 : i32
    %c0_i32_1 = arith.constant 0 : i32
    return %c0_i32, %c0_i32_0 : i32, i32
  }
  func.func @transform_4(%arg0: i32) -> (i32, i32) {
    %c0_i32 = arith.constant 0 : i32
    %c0_i32_0 = arith.constant 0 : i32
    %c0_i32_1 = arith.constant 0 : i32
    return %c0_i32, %c0_i32_0 : i32, i32
  }
  func.func @transform_5(%arg0: i32) -> (i32, i32) {
    %c0_i32 = arith.constant 0 : i32
    %c0_i32_0 = arith.constant 0 : i32
    %c0_i32_1 = arith.constant 0 : i32
    return %c0_i32, %c0_i32_0 : i32, i32
  }
  func.func @transform_6(%arg0: i32) -> (i32, i32, i32) {
    %c0_i32 = arith.constant 0 : i32
    %c0_i32_0 = arith.constant 0 : i32
    %c0_i32_1 = arith.constant 0 : i32
    return %arg0, %c0_i32, %c0_i32_0 : i32, i32, i32
  }
}

</mosaic_0001>

<bundles_post_ra>
// kernel: mbv3_teacher_forward.1
= control target key start
LH: loop header
LB: loop body
LE: loop exit
PB: predicated region body
PF: predicated region fallthrough
CT: control target
= control target key end

     0   :  { %v735_v1 = vmov 0   ;;  %vm55_vm0 = vcmask 261120   ;;  %vm231_vm1 = vcmask 130048   ;;  %vm114_vm2 = vcmask 7168   ;;  %s934_s0 = inlined_call_operand.vmem [shape: bf16[32,256], index: 0, kind: input, shape index: {}]   ;;  %s935_s1 = inlined_call_operand.vmem [shape: bf16[16,32], index: 1, kind: input, shape index: {}]   ;;  %s936_s2 = inlined_call_operand.vmem [shape: f32[128,16], index: 2, kind: input, shape index: {}]   ;;  %s937_s3 = inlined_call_operand.vmem [shape: f32[128,1], index: 3, kind: input, shape index: {}]   ;;  %s938_s5 = inlined_call_operand.vmem [shape: f32[32,1], index: 5, kind: input, shape index: {}]   ;;  %s939_s4 = inlined_call_operand.vmem [shape: f32[32,128], index: 4, kind: input, shape index: {}]   ;;  %s940_s6 = inlined_call_operand.vmem [shape: f32[1,32,2], index: 6, kind: output, shape index: {}]  }
   0x1   :  { %v728_v0 = vld [vmem:[%s934_s0 + $0x4] ss:$8 sps:$4 sm:$0xff]   ;;  %91 = vmatprep.mubr.bf16.mxu0 %v735_v1  ;;  %727 = vset.pattern.permute.xlu1 %v735_v1  ;;  %v730_v2 = vld [vmem:[%s934_s0] ss:$8 sps:$4 sm:$0xff]   ;;  %v731_v3 = vld [vmem:[%s934_s0 + $0x14] ss:$8 sps:$4 sm:$0xff]  }
   0x2   :  { %726 = vset.pattern.permute.xlu0 %v735_v1  ;;  %59 = vmatprep.subr.bf16.mxu0 %v728_v0  ;;  %v733_v4 = vld [vmem:[%s934_s0 + $0x10] ss:$8 sps:$4 sm:$0xff]   ;;  %v734_v5 = vld [vmem:[%s935_s1] sm:$0xff]   ;;  %v136_v15 = vld [vmem:[%s937_s3 + $0x8] sm:$0xff]  ;;  %vm554_vm3 = vcmask 15360  }
   0x3   :  { %60 = vmatpush1.bf16.msra.mxu0 %v730_v2  ;;  %v119_v14 = vld [vmem:[%s936_s2] sm:$0xff]  ;;  %v137_v16 = vld [vmem:[%s937_s3 + $0x10] sm:$0xff]  ;;  %v138_v17 = vld [vmem:[%s937_s3 + $0x18] sm:$0xff] }
   0x4   :  { %61 = vmatprep.subr.bf16.mxu0 %v731_v3  ;;  %627 = vmatprep.mubr.msk.f32.mxu1 %vm231_vm1, %v119_v14  ;;  %v135_v18 = vld [vmem:[%s937_s3] sm:$0xff]  ;;  %v144_v19 = vld [vmem:[%s937_s3 + $0x48] sm:$0xff]  ;;  %v146_v21 = vld [vmem:[%s937_s3 + $0x58] sm:$0xff] }
   0x5   :  { %v139_v20 = vld [vmem:[%s937_s3 + $0x20] sm:$0xff]  ;;  %v140_v22 = vld [vmem:[%s937_s3 + $0x28] sm:$0xff]  ;;  %v141_v24 = vld [vmem:[%s937_s3 + $0x30] sm:$0xff] }
   0x6   :  { %v148_v23 = vld [vmem:[%s937_s3 + $0x68] sm:$0xff]  ;;  %v150_v25 = vld [vmem:[%s937_s3 + $0x78] sm:$0xff]  ;;  %v143_v28 = vld [vmem:[%s937_s3 + $0x40] sm:$0xff] }
   0x7   :  { %62 = vmatpush1.bf16.msra.mxu0 %v733_v4  ;;  %v142_v26 = vld [vmem:[%s937_s3 + $0x38] sm:$0xff]  ;;  %v446_v27 = vld [vmem:[%s938_s5 + $0x8] sm:$0xff]  ;;  %v145_v30 = vld [vmem:[%s937_s3 + $0x50] sm:$0xff] }
   0x8   :  { %v448_v29 = vld [vmem:[%s938_s5 + $0x18] sm:$0xff]  ;;  %v147_v31 = vld [vmem:[%s937_s3 + $0x60] sm:$0xff]  ;;  %v149_v32 = vld [vmem:[%s937_s3 + $0x70] sm:$0xff] }
   0x9   :  { %v445_v33 = vld [vmem:[%s938_s5] sm:$0xff]  ;;  %v447_v34 = vld [vmem:[%s938_s5 + $0x10] sm:$0xff]  ;;  %v120_v44 = vld [vmem:[%s936_s2 + $0x8] sm:$0xff] }
   0xa   :  { %568 = vmatmul.mubr.msk.bf16.vlgmr.msra.gmra.mrb[0].mxu0 %vm55_vm0, %v734_v5  ;;  %v121_v45 = vld [vmem:[%s936_s2 + $0x10] sm:$0xff]  ;;  %v122_v46 = vld [vmem:[%s936_s2 + $0x18] sm:$0xff]  ;;  %v123_v47 = vld [vmem:[%s936_s2 + $0x20] sm:$0xff] }
   0xb   :  { %v124_v48 = vld [vmem:[%s936_s2 + $0x28] sm:$0xff]  ;;  %v125_v49 = vld [vmem:[%s936_s2 + $0x30] sm:$0xff]  ;;  %v126_v50 = vld [vmem:[%s936_s2 + $0x38] sm:$0xff] }
   0xc   :  { %v127_v51 = vld [vmem:[%s936_s2 + $0x40] sm:$0xff]  ;;  %v128_v52 = vld [vmem:[%s936_s2 + $0x48] sm:$0xff]  ;;  %v129_v53 = vld [vmem:[%s936_s2 + $0x50] sm:$0xff] }
   0xd   :  { %v130_v54 = vld [vmem:[%s936_s2 + $0x58] sm:$0xff]  ;;  %v131_v55 = vld [vmem:[%s936_s2 + $0x60] sm:$0xff]  ;;  %v132_v56 = vld [vmem:[%s936_s2 + $0x68] sm:$0xff] }
   0xe   :  { %v133_v57 = vld [vmem:[%s936_s2 + $0x70] sm:$0xff]  ;;  %v134_v58 = vld [vmem:[%s936_s2 + $0x78] sm:$0xff]  ;;  %v441_v59 = vld [vmem:[%s939_s4] sm:$0xff] }
  0xdd   :  { %v93_v6 = vpop.f32.mrb[0].mxu0 }
  0xde   :  { %v95_v7 = vpop.f32.mrb[1].mxu0  ;;  %v102_v8 = vmax.f32 %v93_v6, 0.0 }
  0xdf   :  { %v97_v9 = vpop.f32.mrb[2].mxu0  ;;  %v103_v10 = vmax.f32 %v95_v7, 0.0 }
  0xe0   :  { %106 = vadd.xlane.f32.xlu0 %v102_v8  ;;  %v99_v11 = vpop.f32.mrb[3].mxu0  ;;  %v104_v12 = vmax.f32 %v97_v9, 0.0 }
  0xe1   :  { %110 = vadd.xlane.f32.xlu1 %v103_v10  ;;  %v105_v13 = vmax.f32 %v99_v11, 0.0 }
  0xe4   :  { %108 = vadd.xlane.f32.xlu0 %v104_v12 }
  0xe5   :  { %112 = vadd.xlane.f32.xlu1 %v105_v13 }
  0xf6   :  { %158 = vperm.xlu1 %727, %v136_v15  }
  0xfa   :  { %163 = vperm.xlu1 %727, %v137_v16   ;;  %153 = vperm.xlu0 %726, %v135_v18  }
  0xfe   :  { %168 = vperm.xlu1 %727, %v138_v17   ;;  %198 = vperm.xlu0 %726, %v144_v19  }
 0x102   :  { %173 = vperm.xlu1 %727, %v139_v20   ;;  %208 = vperm.xlu0 %726, %v146_v21  }
 0x106   :  { %178 = vperm.xlu1 %727, %v140_v22   ;;  %218 = vperm.xlu0 %726, %v148_v23  }
 0x10a   :  { %183 = vperm.xlu1 %727, %v141_v24   ;;  %228 = vperm.xlu0 %726, %v150_v25  }
 0x10e   :  { %188 = vperm.xlu1 %727, %v142_v26   ;;  %456 = vperm.xlu0 %726, %v446_v27  }
 0x112   :  { %193 = vperm.xlu1 %727, %v143_v28   ;;  %466 = vperm.xlu0 %726, %v448_v29  }
 0x116   :  { %203 = vperm.xlu1 %727, %v145_v30  }
 0x11a   :  { %213 = vperm.xlu1 %727, %v147_v31  }
 0x11e   :  { %223 = vperm.xlu1 %727, %v149_v32  }
 0x122   :  { %451 = vperm.xlu1 %727, %v445_v33  }
 0x126   :  { %461 = vperm.xlu1 %727, %v447_v34  }
 0x16d   :  { %v107_v35 = vpop.xlane.xlu0 %106 }
 0x16e   :  { %v111_v36 = vpop.xlane.xlu1 %110 }
 0x16f   :  { %v115_v37 = vsel %vm114_vm2, %v107_v35, %v111_v36 }
 0x170   :  { %v117_v41 = vmul.f32 0.015625, %v115_v37 }
 0x171   :  { %v109_v38 = vpop.xlane.xlu0 %108 }
 0x172   :  { %v113_v39 = vpop.xlane.xlu1 %112 }
 0x173   :  { %v116_v40 = vsel %vm114_vm2, %v109_v38, %v113_v39 }
 0x174   :  { %v118_v42 = vmul.f32 0.015625, %v116_v40 }
 0x176   :  { %v689_v43 = vpack.c.bf16 %v118_v42, %v117_v41  ;;  %v159_v60 = vpop.permute.xlu1 %158 }
 0x178   :  { %690 = vmatprep.subr.bf16.mxu1 %v689_v43 }
 0x179   :  { %692 = vmatpush3.bf16.msra.mxu1 %v689_v43  ;;  %v154_v3 = vpop.permute.xlu0 %153 }
 0x17a   :  { %v164_v61 = vpop.permute.xlu1 %163 }
 0x17c   :  { %628 = vmatmul.mubr.msk.f32.vlgmr.msra.gmra.mrb[0].mxu1 %vm231_vm1, %v120_v44 }
 0x17d   :  { %630 = vmatprep.mubr.msk.f32.mxu1 %vm231_vm1, %v121_v45  ;;  %v199_v20 = vpop.permute.xlu0 %198 }
 0x17e   :  { %v169_v62 = vpop.permute.xlu1 %168 }
 0x180   :  { %631 = vmatmul.mubr.msk.f32.gmra.mrb[2].mxu1 %vm231_vm1, %v122_v46 }
 0x181   :  { %633 = vmatprep.mubr.msk.f32.mxu1 %vm231_vm1, %v123_v47  ;;  %v209_v32 = vpop.permute.xlu0 %208 }
 0x182   :  { %v174_v63 = vpop.permute.xlu1 %173 }
 0x184   :  { %634 = vmatmul.mubr.msk.f32.gmra.mrb[4].mxu1 %vm231_vm1, %v124_v48 }
 0x185   :  { %636 = vmatprep.mubr.msk.f32.mxu1 %vm231_vm1, %v125_v49  ;;  %v219_v45 = vpop.permute.xlu0 %218 }
 0x186   :  { %v179_v0 = vpop.permute.xlu1 %178 }
 0x188   :  { %637 = vmatmul.mubr.msk.f32.gmra.mrb[6].mxu1 %vm231_vm1, %v126_v50 }
 0x189   :  { %639 = vmatprep.mubr.msk.f32.mxu1 %vm231_vm1, %v127_v51 }
 0x18a   :  { %v184_v1 = vpop.permute.xlu1 %183 }
 0x18c   :  { %640 = vmatmul.mubr.msk.f32.gmra.mrb[8].mxu1 %vm231_vm1, %v128_v52 }
 0x18d   :  { %642 = vmatprep.mubr.msk.f32.mxu1 %vm231_vm1, %v129_v53 }
 0x18e   :  { %v189_v10 = vpop.permute.xlu1 %188 }
 0x190   :  { %643 = vmatmul.mubr.msk.f32.gmra.mrb[10].mxu1 %vm231_vm1, %v130_v54 }
 0x191   :  { %645 = vmatprep.mubr.msk.f32.mxu1 %vm231_vm1, %v131_v55 }
 0x192   :  { %v194_v23 = vpop.permute.xlu1 %193 }
 0x194   :  { %646 = vmatmul.mubr.msk.f32.gmra.mrb[12].mxu1 %vm231_vm1, %v132_v56 }
 0x195   :  { %648 = vmatprep.mubr.msk.f32.mxu1 %vm231_vm1, %v133_v57  ;;  %v229_v57 = vpop.permute.xlu0 %228 }
 0x196   :  { %v204_v35 = vpop.permute.xlu1 %203 }
 0x198   :  { %649 = vmatmul.mubr.msk.f32.gmra.mrb[14].mxu1 %vm231_vm1, %v134_v58 }
 0x199   :  { %683 = vmatprep.mubr.f32.mxu1 %v441_v59 }
 0x19a   :  { %v214_v48 = vpop.permute.xlu1 %213 }
 0x24f   :  { %v629_v2 = vpop.f32.mrb[0].mxu1 }
 0x250   :  { %v352_v4 = vadd.f32 %v629_v2, %v159_v60  ;;  %v346_v5 = vpop.f32.mrb[1].mxu1  ;;  %v224_v60 = vpop.permute.xlu1 %223 }
 0x251   :  { %v347_v6 = vadd.f32 %v346_v5, %v154_v3  ;;  %v443_v5 = vld [vmem:[%s939_s4 + $0x10] sm:$0xff] }
 0x252   :  { %v426_v7 = vmax.f32 %v352_v4, 0.0  ;;  %v442_v4 = vld [vmem:[%s939_s4 + $0x8] sm:$0xff] }
 0x253   :  { %v425_v8 = vmax.f32 %v347_v6, 0.0  ;;  %v632_v9 = vpop.f32.mrb[2].mxu1  ;;  %v444_v6 = vld [vmem:[%s939_s4 + $0x18] sm:$0xff] }
 0x254   :  { %v362_v11 = vadd.f32 %v632_v9, %v169_v62  ;;  %v356_v12 = vpop.f32.mrb[3].mxu1 }
 0x255   :  { %v693_v13 = vpack.c.bf16 %v426_v7, %v425_v8  ;;  %v357_v14 = vadd.f32 %v356_v12, %v164_v61  ;;  %v457_v7 = vpop.permute.xlu0 %456  ;;  %v452_v8 = vpop.permute.xlu1 %451 }
 0x256   :  { %v428_v15 = vmax.f32 %v362_v11, 0.0 }
 0x257   :  { %v427_v16 = vmax.f32 %v357_v14, 0.0  ;;  %v635_v17 = vpop.f32.mrb[4].mxu1  ;;  %694 = vmatprep.subr.bf16.mxu1 %v693_v13 }
 0x258   :  { %v372_v18 = vadd.f32 %v635_v17, %v179_v0  ;;  %v366_v19 = vpop.f32.mrb[5].mxu1  ;;  %696 = vmatpush3.bf16.msra.mxu1 %v693_v13 }
 0x259   :  { %v697_v21 = vpack.c.bf16 %v428_v15, %v427_v16  ;;  %v367_v22 = vadd.f32 %v366_v19, %v174_v63  ;;  %v467_v13 = vpop.permute.xlu0 %466  ;;  %v462_v15 = vpop.permute.xlu1 %461 }
 0x25a   :  { %v430_v24 = vmax.f32 %v372_v18, 0.0 }
 0x25b   :  { %v429_v25 = vmax.f32 %v367_v22, 0.0  ;;  %v638_v26 = vpop.f32.mrb[6].mxu1  ;;  %698 = vmatprep.subr.bf16.mxu1 %v697_v21 }
 0x25c   :  { %v382_v27 = vadd.f32 %v638_v26, %v189_v10  ;;  %v376_v28 = vpop.f32.mrb[7].mxu1  ;;  %700 = vmatpush3.bf16.msra.mxu1 %v697_v21 }
 0x25d   :  { %v701_v29 = vpack.c.bf16 %v430_v24, %v429_v25  ;;  %v377_v30 = vadd.f32 %v376_v28, %v184_v1 }
 0x25e   :  { %v432_v31 = vmax.f32 %v382_v27, 0.0 }
 0x25f   :  { %v431_v33 = vmax.f32 %v377_v30, 0.0  ;;  %v641_v34 = vpop.f32.mrb[8].mxu1  ;;  %702 = vmatprep.subr.bf16.mxu1 %v701_v29 }
 0x260   :  { %v392_v36 = vadd.f32 %v641_v34, %v199_v20  ;;  %v386_v37 = vpop.f32.mrb[9].mxu1  ;;  %704 = vmatpush3.bf16.msra.mxu1 %v701_v29 }
 0x261   :  { %v705_v38 = vpack.c.bf16 %v432_v31, %v431_v33  ;;  %v387_v39 = vadd.f32 %v386_v37, %v194_v23 }
 0x262   :  { %v434_v40 = vmax.f32 %v392_v36, 0.0 }
 0x263   :  { %v433_v41 = vmax.f32 %v387_v39, 0.0  ;;  %v644_v42 = vpop.f32.mrb[10].mxu1  ;;  %706 = vmatprep.subr.bf16.mxu1 %v705_v38 }
 0x264   :  { %v402_v43 = vadd.f32 %v644_v42, %v209_v32  ;;  %v396_v44 = vpop.f32.mrb[11].mxu1  ;;  %708 = vmatpush3.bf16.msra.mxu1 %v705_v38 }
 0x265   :  { %v709_v46 = vpack.c.bf16 %v434_v40, %v433_v41  ;;  %v397_v47 = vadd.f32 %v396_v44, %v204_v35 }
 0x266   :  { %v436_v49 = vmax.f32 %v402_v43, 0.0 }
 0x267   :  { %v435_v50 = vmax.f32 %v397_v47, 0.0  ;;  %v647_v51 = vpop.f32.mrb[12].mxu1  ;;  %710 = vmatprep.subr.bf16.mxu1 %v709_v46 }
 0x268   :  { %v412_v52 = vadd.f32 %v647_v51, %v219_v45  ;;  %v406_v53 = vpop.f32.mrb[13].mxu1  ;;  %712 = vmatpush3.bf16.msra.mxu1 %v709_v46 }
 0x269   :  { %v713_v54 = vpack.c.bf16 %v436_v49, %v435_v50  ;;  %v407_v55 = vadd.f32 %v406_v53, %v214_v48 }
 0x26a   :  { %v438_v56 = vmax.f32 %v412_v52, 0.0 }
 0x26b   :  { %v437_v58 = vmax.f32 %v407_v55, 0.0  ;;  %v650_v59 = vpop.f32.mrb[14].mxu1  ;;  %714 = vmatprep.subr.bf16.mxu1 %v713_v54 }
 0x26c   :  { %v422_v61 = vadd.f32 %v650_v59, %v229_v57  ;;  %v416_v62 = vpop.f32.mrb[15].mxu1  ;;  %716 = vmatpush3.bf16.msra.mxu1 %v713_v54 }
 0x26d   :  { %v717_v63 = vpack.c.bf16 %v438_v56, %v437_v58  ;;  %v417_v0 = vadd.f32 %v416_v62, %v224_v60 }
 0x26e   :  { %v440_v1 = vmax.f32 %v422_v61, 0.0 }
 0x26f   :  { %v439_v2 = vmax.f32 %v417_v0, 0.0  ;;  %718 = vmatprep.subr.bf16.mxu1 %v717_v63 }
 0x270   :  { %720 = vmatpush3.bf16.msra.mxu1 %v717_v63 }
 0x271   :  { %v721_v3 = vpack.c.bf16 %v440_v1, %v439_v2 }
 0x273   :  { %722 = vmatprep.subr.bf16.mxu1 %v721_v3 }
 0x274   :  { %724 = vmatpush3.bf16.msra.mxu1 %v721_v3 }
 0x277   :  { %684 = vmatmul.mubr.f32.vlgmr.msra.gmra.mrb[16].mxu1 %v442_v4 }
 0x278   :  { %686 = vmatprep.mubr.f32.mxu1 %v443_v5 }
 0x27b   :  { %687 = vmatmul.mubr.f32.gmra.mrb[18].mxu1 %v444_v6 }
 0x34a   :  { %v685_v9 = vpop.f32.mrb[16].mxu1 }
 0x34b   :  { %v541_v10 = vadd.f32 %v685_v9, %v457_v7  ;;  %v535_v11 = vpop.f32.mrb[17].mxu1 }
 0x34c   :  { %v536_v12 = vadd.f32 %v535_v11, %v452_v8 }
 0x34d   :  { %556 = vst.msk [vmem:[%s940_s6 + $0x8] sm:$0xff] %vm554_vm3, %v541_v10 }
 0x34e   :  { %555 = vst.msk [vmem:[%s940_s6] sm:$0xff] %vm554_vm3, %v536_v12  ;;  %v688_v14 = vpop.f32.mrb[18].mxu1 }
 0x34f   :  { %v551_v16 = vadd.f32 %v688_v14, %v467_v13  ;;  %v545_v17 = vpop.f32.mrb[19].mxu1 }
 0x350   :  { %v546_v18 = vadd.f32 %v545_v17, %v462_v15 }
 0x351   :  { %558 = vst.msk [vmem:[%s940_s6 + $0x18] sm:$0xff] %vm554_vm3, %v551_v16 }
 0x352   :  { %557 = vst.msk [vmem:[%s940_s6 + $0x10] sm:$0xff] %vm554_vm3, %v546_v18 }

</bundles_post_ra>
